<compile_context>
chip_gen: v5e
topology: v5e:2x2
jax: 0.10.0
libtpu: 0.0.40
codegen_flags: <defaults>
</compile_context>

<pallas_src>
import functools

import jax
import jax.numpy as jnp
from jax.experimental import pallas as pl
from jax.experimental.pallas import tpu as pltpu

_MIB = 1024 * 1024


def _linear_svm_kernel(x_ref, w_ref, b_ref, o_ref, *, fold, feat):
    # x_ref: (tb, fold*feat) VMEM    w_ref: (1, fold*feat) VMEM
    # b_ref: (1, 1) SMEM             o_ref: (1, fold, tb) VMEM
    x = x_ref[...].astype(jnp.float32)
    w = w_ref[...].astype(jnp.float32)            # (1, fold*feat) broadcasts over rows
    xw = x * w                                    # VPU elementwise multiply
    b = b_ref[0, 0]
    for j in range(fold):                         # static unroll; fold is small
        # XLU lane reduction over this row-segment -> one logical row per sublane row.
        seg = jnp.sum(xw[:, j * feat:(j + 1) * feat], axis=-1)   # (tb,)
        o_ref[0, j, :] = (seg + b).astype(o_ref.dtype)           # lane-dense store


def linear_svm_forward(x, weight, bias, *, target_tile_bytes=12 * _MIB):
    """Pallas equivalent of nn.Linear(input_dim, 1): returns x @ weight.T + bias."""
    B, D = x.shape
    assert weight.shape == (1, D)

    # ---- Small-D row folding (free, layout-preserving reshape) -------------
    fold = 1
    if D < 128 and 128 % D == 0 and B % (128 // D) == 0:
        fold = 128 // D
    if fold > 1:
        x_f = x.reshape(B // fold, fold * D)                 # contiguous -> no copy
        w_f = jnp.tile(weight.reshape(1, D), (1, fold))      # (1, fold*D), tiny
    else:
        x_f = x
        w_f = weight.reshape(1, D)
    Bf, Df = x_f.shape

    # ---- Generation-aware VMEM budget ---------------------------------------
    try:
        vmem_cap = int(pltpu.get_tpu_info().vmem_capacity_bytes)
    except Exception:
        vmem_cap = 64 * _MIB                                  # assume tightest (v7x)
    vmem_limit = int(min(vmem_cap * 3 // 4, 64 * _MIB))       # 64 MiB v5e/v6e, 48 MiB v7x

    # ---- Tile rows from the *lane-padded* VMEM footprint --------------------
    lane_padded_row_bytes = pl.cdiv(Df, 128) * 128 * 4        # f32 row, lanes pad to 128
    tb = max(8, (target_tile_bytes // lane_padded_row_bytes) // 8 * 8)
    # Keep >= 2 tiles when the batch allows it, so both v7x cores get work.
    if Bf > 8 and tb >= Bf:
        tb = max(8, pl.cdiv(pl.cdiv(Bf, 2), 8) * 8)
    if tb >= Bf:
        tb = Bf                                               # single full-extent tile
    num_tiles = pl.cdiv(Bf, tb)
    # TODO(synk): for extremely wide feature vectors (8 lane-padded rows x 2
    # buffers > vmem_limit) add a K grid axis over D with a VMEM accumulator.

    b2 = bias.reshape(1, 1).astype(jnp.float32)               # scalar bias in SMEM

    kernel = functools.partial(_linear_svm_kernel, fold=fold, feat=Df // fold)

    out = pl.pallas_call(
        kernel,
        out_shape=jax.ShapeDtypeStruct((num_tiles, fold, tb), x.dtype),
        grid=(num_tiles,),
        in_specs=[
            pl.BlockSpec((tb, Df), lambda i: (i, 0)),         # streamed, double-buffered,
                                                              # last block may be ragged
            pl.BlockSpec((1, Df), lambda i: (0, 0)),          # weight: VMEM-resident
            pl.BlockSpec(memory_space=pltpu.SMEM),            # bias scalar
        ],
        out_specs=pl.BlockSpec((1, fold, tb), lambda i: (i, 0, 0)),
        compiler_params=pltpu.CompilerParams(
            dimension_semantics=("parallel",),                # megacore split over tiles
            vmem_limit_bytes=vmem_limit,
        ),
        cost_estimate=pl.CostEstimate(
            flops=2 * B * D,
            transcendentals=0,
            bytes_accessed=4 * (B * D + D + B),
        ),
    )(x_f, w_f, b2)

    # out[i, j, r] holds the result for original row (i*tb + r)*fold + j.
    # The output is only ~B floats, so this reshuffle/slice is negligible.
    return out.transpose(0, 2, 1).reshape(-1)[:B].reshape(B, 1)


if __name__ == "__main__":
    key = jax.random.PRNGKey(0)
    kx, kw, kb = jax.random.split(key, 3)

    input_dim = 32
    # Deterministic synthetic parameters (mirrors nn.Linear's uniform init range).
    bound = 1.0 / jnp.sqrt(jnp.float32(input_dim))
    weight = jax.random.uniform(kw, (1, input_dim), jnp.float32, -bound, bound)
    bias = jax.random.uniform(kb, (1,), jnp.float32, -bound, bound)

    # Case batch=10: not a multiple of 8 -> exercises the ragged last block
    #                (no host-side padding) and the 2-tile megacore split.
    # Case batch=16: multiple of 128//D  -> exercises the small-D row-fold path.
    for batch in (10, 16):
        xk = jax.random.fold_in(kx, batch)
        x = jax.random.normal(xk, (batch, input_dim), dtype=jnp.float32)

        out = jax.block_until_ready(linear_svm_forward(x, weight, bias))

        ref = x @ weight.T + bias                 # same math as torch nn.Linear forward
        assert out.shape == (batch, 1)
        assert jnp.allclose(out, ref, atol=1e-5, rtol=1e-5)

    print("KERNEL_OK")
</pallas_src>

<mosaic_0001>
module attributes {stable_mosaic.version = 11 : i64} {
  func.func @_linear_svm_kernel(%arg0: i32, %arg1: memref<8x32xf32, #tpu.memory_space<vmem>>, %arg2: memref<1x32xf32, #tpu.memory_space<vmem>>, %arg3: memref<1x1xf32, #tpu.memory_space<smem>>, %arg4: memref<1x1x8xf32, #tpu.memory_space<vmem>>) attributes {dimension_semantics = [#tpu.dimension_semantics<parallel>], iteration_bounds = array<i64: 2>, scalar_prefetch = 0 : i64, scratch_operands = 0 : i64, tpu.core_type = #tpu.core_type<tc>, window_params = [{transform_indices = @transform_0, window_bounds = array<i64: 8, 32>}, {pipeline_mode = #tpu.pipeline_mode<synchronous>, transform_indices = @transform_1, window_bounds = array<i64: 1, 32>}, {transform_indices = @transform_2, window_bounds = array<i64: 1, 1>}, {transform_indices = @transform_3, window_bounds = array<i64: 1, 1, 8>}]} {
    %c0 = arith.constant 0 : index
    %c0_0 = arith.constant 0 : index
    %0 = vector.load %arg1[%c0, %c0_0] : memref<8x32xf32, #tpu.memory_space<vmem>>, vector<8x32xf32>
    %c0_1 = arith.constant 0 : index
    %c0_2 = arith.constant 0 : index
    %1 = vector.load %arg2[%c0_1, %c0_2] : memref<1x32xf32, #tpu.memory_space<vmem>>, vector<1x32xf32>
    %2 = vector.broadcast %1 : vector<1x32xf32> to vector<8x32xf32>
    %3 = arith.mulf %0, %2 : vector<8x32xf32>
    %c0_3 = arith.constant 0 : index
    %c0_4 = arith.constant 0 : index
    %4 = memref.load %arg3[%c0_3, %c0_4] : memref<1x1xf32, #tpu.memory_space<smem>>
    %cst = arith.constant dense<0.000000e+00> : vector<8xf32>
    %5 = vector.multi_reduction <add>, %3, %cst [1] : vector<8x32xf32> to vector<8xf32>
    %6 = vector.broadcast %4 : f32 to vector<8xf32>
    %7 = arith.addf %5, %6 : vector<8xf32>
    %c0_5 = arith.constant 0 : index
    %c0_6 = arith.constant 0 : index
    %c0_7 = arith.constant 0 : index
    %8 = vector.load %arg4[%c0_5, %c0_6, %c0_7] : memref<1x1x8xf32, #tpu.memory_space<vmem>>, vector<1x1x8xf32>
    %9 = vector.shape_cast %8 : vector<1x1x8xf32> to vector<8xf32>
    %10 = vector.shape_cast %7 : vector<8xf32> to vector<1x1x8xf32>
    tpu.vector_store %arg4[%c0_5, %c0_6, %c0_7], %10 {strides = array<i32>} : memref<1x1x8xf32, #tpu.memory_space<vmem>>, vector<1x1x8xf32>,
    return
  }
  func.func @transform_0(%arg0: i32) -> (i32, i32) {
    %c0_i32 = arith.constant 0 : i32
    %c0_i32_0 = arith.constant 0 : i32
    return %arg0, %c0_i32 : i32, i32
  }
  func.func @transform_1(%arg0: i32) -> (i32, i32) {
    %c0_i32 = arith.constant 0 : i32
    %c0_i32_0 = arith.constant 0 : i32
    %c0_i32_1 = arith.constant 0 : i32
    return %c0_i32, %c0_i32_0 : i32, i32
  }
  func.func @transform_2(%arg0: i32) -> (i32, i32) {
    %c0_i32 = arith.constant 0 : i32
    %c0_i32_0 = arith.constant 0 : i32
    %c0_i32_1 = arith.constant 0 : i32
    return %c0_i32, %c0_i32_0 : i32, i32
  }
  func.func @transform_3(%arg0: i32) -> (i32, i32, i32) {
    %c0_i32 = arith.constant 0 : i32
    %c0_i32_0 = arith.constant 0 : i32
    %c0_i32_1 = arith.constant 0 : i32
    return %arg0, %c0_i32, %c0_i32_0 : i32, i32, i32
  }
}

</mosaic_0001>

<bundles_post_ra>
// kernel: tpu_custom_call.1
= control target key start
LH: loop header
LB: loop body
LE: loop exit
PB: predicated region body
PF: predicated region fallthrough
CT: control target
= control target key end

     0   :  { %s595_s0 = inlined_call_operand.hbm [shape: f32[10,32], index: 0, kind: input, shape index: {}]   ;;  %s596_s1 = inlined_call_operand.vmem [shape: f32[1,32], index: 1, kind: input, shape index: {}]   ;;  %s597_s2 = inlined_call_operand.<no memory space> [shape: f32[1,1], index: 2, kind: input, shape index: {}]   ;;  %s598_s3 = inlined_call_operand.hbm [shape: f32[2,1,8], index: 3, kind: output, shape index: {}]  }
   0x1   :  { %8 = sst [smem:[#allocation2]] %s597_s2 }
   0x2   :  { %9 = vsyncpa [#allocation4], 0 }
   0x3   :  { %11 = vsyncpa [#allocation4 + $0x1], 0 }
   0x4   :  { %12 = vsyncpa [#allocation5], 0 }
   0x5   :  { %14 = vsyncpa [#allocation5 + $0x1], 0  ;;  %s464_s14 = smov 0   ;;  %s466_s15 = smov 0  }
   0x6   :  { %s468_s16 = smov 0   ;;  %s470_s17 = smov 0  }
   0x7 LB: > { %s485_s2 = sadd.s32 4294967295, %s439_s17   ;;  %s287_s18 = sadd.s32 4294967294, %s439_s17   ;;  %s439_s17 = sphi %s470_s17, %s608_s17   ;;  %s435_s16 = sphi %s468_s16, %s607_s16   ;;  %s431_s15 = sphi %s466_s15, %s606_s15   ;;  %s427_s14 = sphi %s464_s14, %s605_s14  }
   0x8   : > { %s489_s19 = sadd.s32 1, %s439_s17   ;;  %s27_s20 = sadd.s32 1, %s435_s16 }
   0x9   : > { %s24_s21 = ssub.s32 %s439_s17, %s489_s19  ;;  %p34_p0 = scmp.ne.s32.totalorder %s435_s16, %s431_s15 }
   0xa   : > { %p25_p1 = scmp.eq.s32.totalorder %s24_s21, 0  ;;  %p35_p2 = scmp.eq.s32.totalorder %s439_s17, 0 }
   0xb   : > { %p40_p3 = scmp.ne.s32.totalorder %s431_s15, %s427_s14  ;;  %p41_p4 = scmp.eq.s32.totalorder %s485_s2, 0 }
   0xc   : > { %s501_s22 = scalar_select %p25_p1, %s435_s16, %s27_s20  }
   0xd   : > { %p503_p5 = por %p35_p2, %p34_p0  ;;  %p507_p6 = por %p41_p4, %p40_p3 }
   0xe   : > { %p106_p7 = scmp.eq.s32.totalorder %s485_s2, 1  ;;  %p112_p8 = scmp.eq.s32.totalorder %s287_s18, 1 }
   0xf   : > { %p308_p10 = scmp.lt.s32.totalorder %s439_s17, 2  ;;  %s138_s27 = sand.u32 1, %s435_s16  }
  0x10   : > { %p514_p11 = por %p106_p7, %p34_p0  ;;  %p518_p12 = por %p112_p8, %p40_p3 }
  0x11   : > { %s291_s28 = sshll.u32 %s439_s17, 3  ;;  %s290_s29 = sshll.u32 %s138_s27, 3 }
  0x12   : > { %s146_s5 = scalar_lea.hbm %s595_s0, %s291_s28  ;;  %s142_s7 = scalar_lea.vmem [#allocation3], %s290_s29 }
  0x13   : > { %s148_s6 = sshll.u32 %s146_s5, 4  ;;  %s150_s8 = sshll.u32 %s142_s7, 4  ;;  %s149_s6 = int_to_ptr.hbm [resolvable:$true] %s148_s6  ;;  %s151_s8 = int_to_ptr.vmem [resolvable:$true] %s150_s8 }
  0x14   : > { %p529_p13 = pnand %p308_p10, %p503_p5  ;;  %p292_p0 = scmp.ge.s32.totalorder %s439_s17, 1 }
  0x15   : > { %p155_p1 = scmp.lt.s32.totalorder %s439_s17, 3  ;;  %s139_s10 = scalar_lea.sflag [#allocation4], %s138_s27 }
  0x16   : > { %s343_s11 = sshra.s32 %s149_s6, 4  ;;  %p347_p3 = pneg %p529_p13  ;;  %s344_s11 = int_to_ptr.hbm [resolvable:$true] %s343_s11 }
  0x17   : > { %s345_s12 = scalar_lea.hbm %s344_s11, 8  ;;  %s350_s20 = scalar_lea.hbm %s595_s0, 16 }
  0x18   : > { %p346_p2 = scmp.ne.s32.totalorder %s344_s11, %s345_s12  ;;  %p351_p5 = scmp.lt.s32.totalorder %s344_s11, %s595_s0 }
  0x19   : > { %p352_p8 = scmp.lt.s32.totalorder %s350_s20, %s345_s12 }
  0x1a   : > { %p348_p4 = pnand %p347_p3, %p346_p2 }
  0x1b   : > { %p353_p10 = por %p352_p8, %p351_p5 }
  0x1c   : > { %p349_p7 = pneg %p348_p4 }
  0x1e   : > { %p354_p9 = pnand %p353_p10, %p349_p7 }
  0x20   : > { %357 = shalt.err (!%p354_p9)
}
  0x21   : > { %303 = dma.hbm_to_vmem [thread:$0]  (!%p529_p13), %s149_s6, 128, %s151_s8, %s139_s10  }
  0x22   : > { %p156_p2 = pnand %p292_p0, %p155_p1 }
  0x23   : > { %s550_s27 = sand.u32 (!%p156_p2), 1, %s431_s15  }
  0x24   : > { %159 = sbr.rel (%p156_p2) target bundleno = 170 (0xaa), region = 32  ;;  %s293_s28 = sshll.u32 (!%p156_p2), %s550_s27, 3 }
  0x25   : > { %s162_s29 = scalar_lea.sflag (!%p156_p2), [#allocation4], %s550_s27  ;;  %s165_s30 = scalar_lea.vmem (!%p156_p2), [#allocation3], %s293_s28 }
  0x29   : > { %418 = dma.done.wait (%p507_p6), %s162_s29, 128  }
  0x2a   : > { %420 = vsyncadd (%p507_p6), %s162_s29, 4294967168  ;;  %v188_v0 = vld [vmem:[%s165_s30] sm:$0xff]  ;;  %vm195_vm0 = vcmask 261120   ;;  %s194_s6 = sld [smem:[#allocation2]]  ;;  %v202_v4 = vlaneseq  ;;  %s217_s9 = scalar_lea.hbm %s598_s3, %s485_s2  ;;  %vm206_vm1 = vcmask 57344  }
  0x2b   : > { %v342_v1 = vld [vmem:[%s596_s1] ss:$0 sm:$0xff]  ;;  %s187_s24 = scalar_lea.vmem [#allocation6], %s550_s27  ;;  %s221_s11 = sshll.u32 %s217_s9, 4  ;;  %s222_s11 = int_to_ptr.hbm [resolvable:$true] %s221_s11 }
  0x2c   : > { %v193_v2 = vmul.f32 %v342_v1, %v188_v0  ;;  %v203_v6 = vand.u32 127, %v202_v4  ;;  %s219_s10 = sshll.u32 %s187_s24, 4  ;;  %s209_s12 = scalar_lea.sflag [#allocation5], %s550_s27  ;;  %s220_s10 = int_to_ptr.vmem [resolvable:$true] %s219_s10 }
  0x2d   : > { %s387_s13 = sshra.s32 %s222_s11, 4  ;;  %s393_s21 = scalar_lea.hbm %s598_s3, 2  ;;  %s388_s13 = int_to_ptr.hbm [resolvable:$true] %s387_s13 }
  0x2e   : > { %v196_v3 = vsel %vm195_vm0, %v193_v2, 0.0  ;;  %s389_s18 = scalar_lea.hbm %s388_s13, 1  ;;  %p394_p0 = scmp.lt.s32.totalorder %s388_s13, %s598_s3 }
  0x2f   : > { %197 = vadd.xlane.f32.xlu0 %v196_v3  ;;  %p390_p6 = scmp.ne.s32.totalorder %s388_s13, %s389_s18  ;;  %p395_p1 = scmp.lt.s32.totalorder %s393_s21, %s389_s18 }
  0x30   : > { %v199_v5 = vstv %s194_s6 }
  0x31   : > { %p391_p9 = pnand %p390_p6, %p514_p11  ;;  %p396_p3 = por %p395_p1, %p394_p0 }
  0x33   : > { %p392_p13 = pneg %p391_p9 }
  0x35   : > { %p397_p4 = pnand %p396_p3, %p392_p13 }
  0xa2   : > { %v198_v7 = vpop.xlane.xlu0 %197 }
  0xa3   : > { %v200_v8 = vadd.f32 %v199_v5, %v198_v7 }
  0xa5   : > { %v204_v9 = vperm.slane %v200_v8, %v203_v6 }
  0xa7   : > { %207 = vst.msk [vmem:[%s187_s24] sm:$0x1] %vm206_vm1, %v204_v9 }
  0xa8   : > { %400 = shalt.err (!%p397_p4)
}
  0xa9   : > { %298 = dma.vmem_to_hbm [thread:$0]  (%p514_p11), %s220_s10, 16, %s222_s11, %s209_s12  }
  0xaa PF: > { %s233_s27 = sand.u32 1, %s427_s14   ;;  %p604_p7 = scmp.ge.s32.totalorder %s439_s17, 2 }
  0xab   : > { %s234_s29 = scalar_lea.sflag [#allocation5], %s233_s27 }
  0xac   : > { %p305_p5 = pnand %p604_p7, %p518_p12 }
  0xae   : > { %p306_p8 = pneg %p305_p5 }
  0xb0   : > { %422 = dma.done.wait (%p306_p8), %s234_s29, 16  }
  0xb1   : > { %424 = vsyncadd (%p306_p8), %s234_s29, 4294967280  ;;  %p17_p10 = scmp.ge.s32.totalorder %s489_s19, 4   ;;  %s605_s14 = smov %s431_s15 }
  0xb2   : > { %s606_s15 = smov %s435_s16  ;;  %s607_s16 = smov %s501_s22 }
  0xb3   : > { %s608_s17 = smov %s489_s19  ;;  %19 = sbr.rel (!%p17_p10) target bundleno = 7 (0x7), region = 77 }
  0xb8   :  { %239 = vsyncpa [#allocation4], 1 }
  0xb9   :  { %241 = vsyncpa [#allocation4 + $0x1], 1 }
  0xba   :  { %242 = vsyncpa [#allocation5], 1 }
  0xbb   :  { %244 = vsyncpa [#allocation5 + $0x1], 1 }

</bundles_post_ra>
